<compile_context>
chip_gen: v5e
topology: v5e:2x2
jax: 0.10.0
libtpu: 0.0.40
codegen_flags: <defaults>
</compile_context>

<pallas_src>
import math
import functools

import jax
import jax.numpy as jnp
from jax import lax
from jax.experimental import pallas as pl
from jax.experimental.pallas import tpu as pltpu

_LANES = 128
_SUBLANES = 8


# -----------------------------------------------------------------------------
# Kernel: one (row_tile, 128) lane-dense tile of the flattened (B, R, 128) view.
# -----------------------------------------------------------------------------
def _pos_enc_kernel(x_ref, pe_ref, pad_ref, *rest, embed_dim, x_scale,
                    drop_threshold, drop_scale):
    # x_ref  : (row_tile, 128)   activations        (batch dim squeezed by BlockSpec)
    # pe_ref : (row_tile, 128)   positional encodings (shared across batch, resident)
    # pad_ref: (row_tile, k)     int8 pad mask, one value per sequence-position group
    # rnd_ref: (row_tile, 128)   uint8 random bits   (training only)
    # o_ref  : (row_tile, 128)
    if drop_threshold is not None:
        rnd_ref, o_ref = rest
    else:
        (o_ref,) = rest

    x = x_ref[...]
    if x_scale != 1.0:
        x = x * x_scale                      # fused embed * sqrt(embed_dim)
    y = x + pe_ref[...]

    # ---- zero padded positions (x[pad_mask] = 0), slim int8 mask -------------
    pad = pad_ref[...].astype(jnp.int32)     # (row_tile, k) -- tiny
    k = pad.shape[-1]
    keep = jnp.where(pad[:, 0:1] == 0, 1.0, 0.0).astype(y.dtype)   # (row_tile, 1)
    if k > 1:
        # Each flat row covers k = 128 // embed_dim consecutive sequence
        # positions; expand each position's mask across its embed_dim lanes.
        lane = lax.broadcasted_iota(jnp.int32, y.shape, dimension=1)
        for j in range(1, k):
            kj = jnp.where(pad[:, j:j + 1] == 0, 1.0, 0.0).astype(y.dtype)
            keep = jnp.where(lane >= j * embed_dim, kj, keep)
    y = y * keep

    # ---- dropout: integer-threshold compare on uint8 bits --------------------
    if drop_threshold is not None:
        rnd = rnd_ref[...].astype(jnp.int32)            # values in [0, 256)
        y = jnp.where(rnd >= drop_threshold, y * drop_scale, jnp.zeros_like(y))

    o_ref[...] = y


# -----------------------------------------------------------------------------
# Buffer construction — mirrors the torch PositionalEncoding.__init__.
# -----------------------------------------------------------------------------
def make_positional_encoding(max_len, embed_dim, dtype=jnp.float32):
    position = jnp.arange(max_len, dtype=jnp.float32)[:, None]
    div_term = jnp.exp(jnp.arange(0, embed_dim, 2, dtype=jnp.float32)
                       * (-math.log(10000.0) / embed_dim))
    pe = jnp.zeros((max_len, embed_dim), jnp.float32)
    pe = pe.at[:, 0::2].set(jnp.sin(position * div_term))
    pe = pe.at[:, 1::2].set(jnp.cos(position * div_term))
    return pe.astype(dtype)


def _choose_row_tile(num_rows, itemsize):
    """Largest row tile targeting ~2 MiB lane-dense blocks (multiple of 8 when tiling)."""
    target_rows = max(_SUBLANES, (2 * 1024 * 1024) // (_LANES * itemsize))
    if num_rows <= target_rows:
        return num_rows
    best = (target_rows // _SUBLANES) * _SUBLANES
    for cand in range(best, _SUBLANES - 1, -_SUBLANES):
        if num_rows % cand == 0:
            return cand
    return best  # non-dividing tile: Pallas masks the ragged edge block


# -----------------------------------------------------------------------------
# Wrapper: layout plumbing (free reshapes) + pallas_call.
# -----------------------------------------------------------------------------
def positional_encoding_forward(x, pe, pad_mask=None, *, dropout_p=0.1,
                                training=False, rng_key=None, x_scale=1.0):
    B, S, E = x.shape
    if (S * E) % _LANES != 0 or not (E % _LANES == 0 or _LANES % E == 0):
        # TODO(synk): embed dims that don't tile into 128 lanes need a padded path.
        raise NotImplementedError("seq_len*embed_dim must tile into 128-wide lanes")

    R = (S * E) // _LANES                       # flat rows per batch element
    k = _LANES // E if E < _LANES else 1        # sequence positions per flat row

    # Lane-dense flattened views (wrapper-side reshapes = free layout glue).
    x_flat = x.reshape(B, R, _LANES)
    pe_flat = pe[:S].astype(x.dtype).reshape(R, _LANES)

    pad_i8 = (jnp.zeros((B, S), jnp.int8) if pad_mask is None
              else pad_mask.astype(jnp.int8))
    if k == 1:                                   # E is a multiple of 128
        pad_grp = jnp.repeat(pad_i8, E // _LANES, axis=1).reshape(B, R, 1)
    else:                                        # E < 128, 128 % E == 0
        pad_grp = pad_i8.reshape(B, R, k)

    use_dropout = bool(training) and float(dropout_p) > 0.0
    if use_dropout:
        thr = min(max(int(round(float(dropout_p) * 256.0)), 1), 255)
        scale = 256.0 / float(256 - thr)         # exact inverse keep-probability
        if rng_key is None:
            rng_key = jax.random.PRNGKey(0)
        rnd = jax.random.bits(rng_key, (B, R, _LANES), dtype=jnp.uint8)
        # TODO(synk): on real TPU the bits could come from the in-kernel hardware PRNG
        # (pltpu.prng_random_bits) to save this HBM read, but that primitive does not
        # lower under interpret mode, so per-element bits are streamed in instead.
    else:
        thr, scale, rnd = None, None, None

    r_tile = _choose_row_tile(R, jnp.dtype(x.dtype).itemsize)
    # Batch is the innermost grid axis -> the pe block index is unchanged across
    # consecutive steps and stays VMEM-resident (fetched once per row tile).
    grid = (pl.cdiv(R, r_tile), B)

    in_specs = [
        pl.BlockSpec((None, r_tile, _LANES), lambda r, b: (b, r, 0)),   # x
        pl.BlockSpec((r_tile, _LANES),       lambda r, b: (r, 0)),      # pe (const over b)
        pl.BlockSpec((None, r_tile, k),      lambda r, b: (b, r, 0)),   # pad mask (int8)
    ]
    args = [x_flat, pe_flat, pad_grp]
    if use_dropout:
        in_specs.append(pl.BlockSpec((None, r_tile, _LANES), lambda r, b: (b, r, 0)))
        args.append(rnd)

    kernel = functools.partial(_pos_enc_kernel, embed_dim=E, x_scale=float(x_scale),
                               drop_threshold=thr, drop_scale=scale)

    out = pl.pallas_call(
        kernel,
        out_shape=jax.ShapeDtypeStruct((B, R, _LANES), x.dtype),
        grid=grid,
        in_specs=in_specs,
        out_specs=pl.BlockSpec((None, r_tile, _LANES), lambda r, b: (b, r, 0)),
        compiler_params=pltpu.CompilerParams(
            dimension_semantics=("parallel", "parallel"),
            vmem_limit_bytes=48 * 1024 * 1024),
    )(*args)
    return out.reshape(B, S, E)


if __name__ == "__main__":
    # Small shapes consistent with the module: batch=2, seq=8, embed_dim=32.
    B, S, E, MAX_LEN = 2, 8, 32, 1024
    key = jax.random.PRNGKey(0)
    kx, km, kd = jax.random.split(key, 3)

    x = jax.random.normal(kx, (B, S, E), dtype=jnp.float32)
    pad_mask = jax.random.bernoulli(km, p=0.25, shape=(B, S))   # True = padded
    pe = make_positional_encoding(MAX_LEN, E)
    emb_scale = math.sqrt(E)   # BidirectionalEncoder: embed(inp) * sqrt(embed_dim)

    # ---- eval mode (dropout = identity): compare against pure-JAX reference --
    out_eval = positional_encoding_forward(x, pe, pad_mask, dropout_p=0.1,
                                           training=False, x_scale=emb_scale)
    jax.block_until_ready(out_eval)
    keep = (~pad_mask).astype(jnp.float32)[:, :, None]
    ref = (x * emb_scale + pe[:S][None, :, :]) * keep
    assert jnp.allclose(out_eval, ref, atol=1e-5, rtol=1e-5), "eval mismatch"

    # ---- bf16 path (native bf16 compute in-kernel on v6e/v7x) -----------------
    out_bf16 = positional_encoding_forward(x.astype(jnp.bfloat16),
                                           pe.astype(jnp.bfloat16), pad_mask,
                                           dropout_p=0.1, training=False,
                                           x_scale=emb_scale)
    jax.block_until_ready(out_bf16)
    assert jnp.allclose(out_bf16.astype(jnp.float32), ref, atol=0.2, rtol=0.05), \
        "bf16 mismatch"

    # ---- training mode: integer-threshold dropout on streamed uint8 bits ------
    # NOTE: random stream differs from torch's RNG; semantics (rate, 1/(1-p) scale) match.
    out_train = positional_encoding_forward(x, pe, pad_mask, dropout_p=0.1,
                                            training=True, rng_key=kd,
                                            x_scale=emb_scale)
    jax.block_until_ready(out_train)
    assert bool(jnp.all(jnp.isfinite(out_train)))
    # Padded positions must be exactly zero regardless of dropout.
    assert bool(jnp.all(jnp.where(pad_mask[:, :, None], out_train, 0.0) == 0.0))

    print("KERNEL_OK")
</pallas_src>

<mosaic_0001>
module attributes {stable_mosaic.version = 11 : i64} {
  func.func @_pos_enc_kernel(%arg0: i32, %arg1: i32, %arg2: memref<1x2x128xf32, #tpu.memory_space<vmem>>, %arg3: memref<2x128xf32, #tpu.memory_space<vmem>>, %arg4: memref<1x2x4xi8, #tpu.memory_space<vmem>>, %arg5: memref<1x2x128xf32, #tpu.memory_space<vmem>>) attributes {dimension_semantics = [#tpu.dimension_semantics<parallel>, #tpu.dimension_semantics<parallel>], iteration_bounds = array<i64: 1, 2>, scalar_prefetch = 0 : i64, scratch_operands = 0 : i64, tpu.core_type = #tpu.core_type<tc>, window_params = [{transform_indices = @transform_0, window_bounds = array<i64: 1, 2, 128>}, {transform_indices = @transform_1, window_bounds = array<i64: 2, 128>}, {transform_indices = @transform_2, window_bounds = array<i64: 1, 2, 4>}, {transform_indices = @transform_3, window_bounds = array<i64: 1, 2, 128>}]} {
    %c0 = arith.constant 0 : index
    %c0_0 = arith.constant 0 : index
    %c0_1 = arith.constant 0 : index
    %0 = vector.load %arg2[%c0, %c0_0, %c0_1] : memref<1x2x128xf32, #tpu.memory_space<vmem>>, vector<1x2x128xf32>
    %1 = vector.shape_cast %0 : vector<1x2x128xf32> to vector<2x128xf32>
    %cst = arith.constant 5.65685415 : f32
    %2 = vector.broadcast %cst : f32 to vector<2x128xf32>
    %3 = arith.mulf %1, %2 : vector<2x128xf32>
    %c0_2 = arith.constant 0 : index
    %c0_3 = arith.constant 0 : index
    %4 = vector.load %arg3[%c0_2, %c0_3] : memref<2x128xf32, #tpu.memory_space<vmem>>, vector<2x128xf32>
    %5 = arith.addf %3, %4 : vector<2x128xf32>
    %c0_4 = arith.constant 0 : index
    %c0_5 = arith.constant 0 : index
    %c0_6 = arith.constant 0 : index
    %6 = vector.load %arg4[%c0_4, %c0_5, %c0_6] : memref<1x2x4xi8, #tpu.memory_space<vmem>>, vector<1x2x4xi8>
    %7 = vector.shape_cast %6 : vector<1x2x4xi8> to vector<2x4xi8>
    %8 = arith.extsi %7 : vector<2x4xi8> to vector<2x4xi32>
    %9 = vector.extract_strided_slice %8 {offsets = [0, 0], sizes = [2, 1], strides = [1, 1]} : vector<2x4xi32> to vector<2x1xi32>
    %c0_i32 = arith.constant 0 : i32
    %10 = vector.broadcast %c0_i32 : i32 to vector<2x1xi32>
    %11 = arith.cmpi eq, %9, %10 : vector<2x1xi32>
    %cst_7 = arith.constant 1.000000e+00 : f32
    %cst_8 = arith.constant 0.000000e+00 : f32
    %12 = vector.broadcast %cst_7 : f32 to vector<2x1xf32>
    %13 = vector.broadcast %cst_8 : f32 to vector<2x1xf32>
    %14 = arith.select %11, %12, %13 : vector<2x1xi1>, vector<2x1xf32>
    %15 = tpu.iota {dimensions = array<i32: 1>} : vector<2x128xi32>
    %16 = vector.extract_strided_slice %8 {offsets = [0, 1], sizes = [2, 1], strides = [1, 1]} : vector<2x4xi32> to vector<2x1xi32>
    %c0_i32_9 = arith.constant 0 : i32
    %17 = vector.broadcast %c0_i32_9 : i32 to vector<2x1xi32>
    %18 = arith.cmpi eq, %16, %17 : vector<2x1xi32>
    %cst_10 = arith.constant 1.000000e+00 : f32
    %cst_11 = arith.constant 0.000000e+00 : f32
    %19 = vector.broadcast %cst_10 : f32 to vector<2x1xf32>
    %20 = vector.broadcast %cst_11 : f32 to vector<2x1xf32>
    %21 = arith.select %18, %19, %20 : vector<2x1xi1>, vector<2x1xf32>
    %c32_i32 = arith.constant 32 : i32
    %22 = vector.broadcast %c32_i32 : i32 to vector<2x128xi32>
    %23 = arith.cmpi sge, %15, %22 : vector<2x128xi32>
    %24 = vector.shape_cast %21 : vector<2x1xf32> to vector<2x1xf32>
    %25 = vector.broadcast %24 : vector<2x1xf32> to vector<2x128xf32>
    %26 = vector.shape_cast %14 : vector<2x1xf32> to vector<2x1xf32>
    %27 = vector.broadcast %26 : vector<2x1xf32> to vector<2x128xf32>
    %28 = arith.select %23, %25, %27 : vector<2x128xi1>, vector<2x128xf32>
    %29 = vector.extract_strided_slice %8 {offsets = [0, 2], sizes = [2, 1], strides = [1, 1]} : vector<2x4xi32> to vector<2x1xi32>
    %c0_i32_12 = arith.constant 0 : i32
    %30 = vector.broadcast %c0_i32_12 : i32 to vector<2x1xi32>
    %31 = arith.cmpi eq, %29, %30 : vector<2x1xi32>
    %cst_13 = arith.constant 1.000000e+00 : f32
    %cst_14 = arith.constant 0.000000e+00 : f32
    %32 = vector.broadcast %cst_13 : f32 to vector<2x1xf32>
    %33 = vector.broadcast %cst_14 : f32 to vector<2x1xf32>
    %34 = arith.select %31, %32, %33 : vector<2x1xi1>, vector<2x1xf32>
    %c64_i32 = arith.constant 64 : i32
    %35 = vector.broadcast %c64_i32 : i32 to vector<2x128xi32>
    %36 = arith.cmpi sge, %15, %35 : vector<2x128xi32>
    %37 = vector.shape_cast %34 : vector<2x1xf32> to vector<2x1xf32>
    %38 = vector.broadcast %37 : vector<2x1xf32> to vector<2x128xf32>
    %39 = arith.select %36, %38, %28 : vector<2x128xi1>, vector<2x128xf32>
    %40 = vector.extract_strided_slice %8 {offsets = [0, 3], sizes = [2, 1], strides = [1, 1]} : vector<2x4xi32> to vector<2x1xi32>
    %c0_i32_15 = arith.constant 0 : i32
    %41 = vector.broadcast %c0_i32_15 : i32 to vector<2x1xi32>
    %42 = arith.cmpi eq, %40, %41 : vector<2x1xi32>
    %cst_16 = arith.constant 1.000000e+00 : f32
    %cst_17 = arith.constant 0.000000e+00 : f32
    %43 = vector.broadcast %cst_16 : f32 to vector<2x1xf32>
    %44 = vector.broadcast %cst_17 : f32 to vector<2x1xf32>
    %45 = arith.select %42, %43, %44 : vector<2x1xi1>, vector<2x1xf32>
    %c96_i32 = arith.constant 96 : i32
    %46 = vector.broadcast %c96_i32 : i32 to vector<2x128xi32>
    %47 = arith.cmpi sge, %15, %46 : vector<2x128xi32>
    %48 = vector.shape_cast %45 : vector<2x1xf32> to vector<2x1xf32>
    %49 = vector.broadcast %48 : vector<2x1xf32> to vector<2x128xf32>
    %50 = arith.select %47, %49, %39 : vector<2x128xi1>, vector<2x128xf32>
    %51 = arith.mulf %5, %50 : vector<2x128xf32>
    %c0_18 = arith.constant 0 : index
    %c0_19 = arith.constant 0 : index
    %c0_20 = arith.constant 0 : index
    %52 = vector.load %arg5[%c0_18, %c0_19, %c0_20] : memref<1x2x128xf32, #tpu.memory_space<vmem>>, vector<1x2x128xf32>
    %53 = vector.shape_cast %52 : vector<1x2x128xf32> to vector<2x128xf32>
    %54 = vector.shape_cast %51 : vector<2x128xf32> to vector<1x2x128xf32>
    tpu.vector_store %arg5[%c0_18, %c0_19, %c0_20], %54 {strides = array<i32>} : memref<1x2x128xf32, #tpu.memory_space<vmem>>, vector<1x2x128xf32>,
    return
  }
  func.func @transform_0(%arg0: i32, %arg1: i32) -> (i32, i32, i32) {
    %c0_i32 = arith.constant 0 : i32
    %c0_i32_0 = arith.constant 0 : i32
    return %arg1, %arg0, %c0_i32 : i32, i32, i32
  }
  func.func @transform_1(%arg0: i32, %arg1: i32) -> (i32, i32) {
    %c0_i32 = arith.constant 0 : i32
    %c0_i32_0 = arith.constant 0 : i32
    return %arg0, %c0_i32 : i32, i32
  }
  func.func @transform_2(%arg0: i32, %arg1: i32) -> (i32, i32, i32) {
    %c0_i32 = arith.constant 0 : i32
    %c0_i32_0 = arith.constant 0 : i32
    return %arg1, %arg0, %c0_i32 : i32, i32, i32
  }
  func.func @transform_3(%arg0: i32, %arg1: i32) -> (i32, i32, i32) {
    %c0_i32 = arith.constant 0 : i32
    %c0_i32_0 = arith.constant 0 : i32
    return %arg1, %arg0, %c0_i32 : i32, i32, i32
  }
}

</mosaic_0001>

<bundles_post_ra>
// kernel: tpu_custom_call.1
= control target key start
LH: loop header
LB: loop body
LE: loop exit
PB: predicated region body
PF: predicated region fallthrough
CT: control target
= control target key end

     0   :  { %8 = vsyncpa [#allocation3], 0  ;;  %s936_s0 = inlined_call_operand.hbm [shape: f32[2,2,128], index: 0, kind: input, shape index: {}]   ;;  %s937_s1 = inlined_call_operand.hbm [shape: f32[2,128], index: 1, kind: input, shape index: {}]   ;;  %s938_s2 = inlined_call_operand.hbm [shape: s8[2,2,4], index: 2, kind: input, shape index: {}]   ;;  %s939_s3 = inlined_call_operand.hbm [shape: f32[2,2,128], index: 3, kind: output, shape index: {}]  }
   0x1   :  { %10 = vsyncpa [#allocation3 + $0x1], 0 }
   0x2   :  { %11 = vsyncpa [#allocation6], 0 }
   0x3   :  { %12 = vsyncpa [#allocation4], 0 }
   0x4   :  { %14 = vsyncpa [#allocation4 + $0x1], 0  ;;  %s752_s12 = smov 0   ;;  %s754_s13 = smov 0  }
   0x5   :  { %s756_s14 = smov 0   ;;  %s758_s15 = smov 0  }
   0x6   :  { %s760_s16 = smov 0   ;;  %s762_s17 = smov 0  }
   0x7 LB: > { %s29_s18 = sadd.s32 1, %s719_s16  ;;  %s41_s19 = sadd.s32 1, %s711_s14  ;;  %s723_s17 = sphi %s762_s17, %s20_s17   ;;  %s719_s16 = sphi %s760_s16, %s950_s16   ;;  %s715_s15 = sphi %s758_s15, %s949_s15   ;;  %s711_s14 = sphi %s756_s14, %s948_s14   ;;  %s707_s13 = sphi %s754_s13, %s947_s13   ;;  %s703_s12 = sphi %s752_s12, %s946_s12  }
   0x8   : > { %p30_p0 = scmp.ge.s32.totalorder %s29_s18, 2  ;;  %p48_p1 = scmp.ne.s32.totalorder %s711_s14, %s707_s13 }
   0x9   : > { %p49_p2 = scmp.eq.s32.totalorder %s723_s17, 0  ;;  %p443_p3 = scmp.ge.s32.totalorder %s723_s17, 2 }
   0xa   : > { %s952_s18 = smov (%p30_p0, %s29_s18), 0  ;;  %p480_p5 = scmp.lt.s32.totalorder %s723_s17, 2 }
   0xb   : > { %p793_p4 = por %p49_p2, %p48_p1  ;;  %s36_s21 = ssub.s32 %s719_s16, %s952_s18 }
   0xc   : > { %s174_s22 = sand.u32 1, %s723_s17   ;;  %p39_p6 = scmp.eq.s32.totalorder %s36_s21, 0 }
   0xd   : > { %s176_s23 = sand.u32 1, %s711_s14   ;;  %s445_s24 = sshll.u32 %s719_s16, 1 }
   0xe   : > { %s804_s25 = scalar_select %p39_p6, %s711_s14, %s41_s19  }
   0xf   : > { %s444_s26 = sshll.u32 %s176_s23, 1  ;;  %s183_s29 = scalar_lea.hbm %s936_s0, %s445_s24 }
  0x10   : > { %s185_s30 = sshll.u32 %s183_s29, 4  ;;  %s178_s4 = scalar_lea.vmem [#allocation2], %s444_s26  ;;  %s186_s30 = int_to_ptr.hbm [resolvable:$true] %s185_s30 }
  0x11   : > { %s187_s5 = sshll.u32 %s178_s4, 4  ;;  %p815_p7 = pnand %p480_p5, %p793_p4  ;;  %s188_s5 = int_to_ptr.vmem [resolvable:$true] %s187_s5 }
  0x12   : > { %s819_s7 = scalar_lea.sflag [#allocation3], %s174_s22  ;;  %s825_s8 = sadd.s32 4294967295, %s723_s17  }
  0x13   : > { %471 = dma.hbm_to_vmem [thread:$0]  (!%p815_p7), %s186_s30, 32, %s188_s5, %s819_s7  }
  0x14   : > { %s440_s9 = sadd.s32 4294967294, %s723_s17   ;;  %p54_p8 = scmp.ne.s32.totalorder %s707_s13, %s703_s12 }
  0x15   : > { %p55_p9 = scmp.eq.s32.totalorder %s825_s8, 0  ;;  %p134_p10 = scmp.eq.s32.totalorder %s825_s8, 1 }
  0x16   : > { %p140_p11 = scmp.eq.s32.totalorder %s440_s9, 1  ;;  %p441_p12 = scmp.ge.s32.totalorder %s723_s17, 1 }
  0x17   : > { %p835_p13 = por %p55_p9, %p54_p8  ;;  %p842_p0 = por %p134_p10, %p48_p1 }
  0x18   : > { %p846_p2 = por %p140_p11, %p54_p8  ;;  %p147_p4 = scmp.lt.s32.totalorder %s723_s17, 3 }
  0x19   : > { %s161_s22 = sshll.u32 %s937_s1, 4  ;;  %s725_s26 = smov [#allocation5]   ;;  %s162_s22 = int_to_ptr.hbm [resolvable:$true] %s161_s22 }
  0x1a   : > { %p854_p5 = pnand %p441_p12, %p147_p4  ;;  %s163_s27 = sshll.u32 %s725_s26, 4  ;;  %s164_s27 = int_to_ptr.vmem [resolvable:$true] %s163_s27 }
  0x1b   : > { %s201_s30 = scalar_lea.hbm %s938_s2, %s719_s16  ;;  %s197_s5 = scalar_lea.vmem [#allocation7], %s176_s23 }
  0x1c   : > { %p464_p1 = pneg %p854_p5  ;;  %s203_s4 = sshll.u32 %s201_s30, 4  ;;  %s204_s4 = int_to_ptr.hbm [resolvable:$true] %s203_s4 }
  0x1d   : > { %s205_s9 = sshll.u32 %s197_s5, 4  ;;  %214 = sbr.rel (%p854_p5) target bundleno = 180 (0xb4), region = 32  ;;  %s206_s9 = int_to_ptr.vmem [resolvable:$true] %s205_s9 }
  0x1e   : > { %p465_p6 = pnand %p464_p1, %p55_p9  ;;  %s216_s20 = sand.u32 (!%p854_p5), 1, %s825_s8  }
  0x1f   : > { %474 = dma.hbm_to_vmem [thread:$0]  (!%p815_p7), %s204_s4, 16, %s206_s9, %s819_s7  }
  0x20   : > { %467 = dma.hbm_to_vmem [thread:$0]  (!%p465_p6), %s162_s22, 32, %s164_s27, [#allocation6]  }
  0x21   : > { %s875_s21 = sand.u32 (!%p854_p5), 1, %s707_s13   ;;  %s217_s28 = scalar_lea.sflag (!%p854_p5), [#allocation3], %s216_s20 }
  0x22   : > { %s447_s26 = sshll.u32 %s875_s21, 1 }
  0x23   : > { %s880_s23 = scalar_lea.vmem [#allocation2], %s447_s26 }
  0x24   : > { %686 = dma.done.wait (%p835_p13), %s217_s28, 32  }
  0x25   : > { %688 = vsyncadd (%p835_p13), %s217_s28, 4294967264 }
  0x26   : > { %690 = dma.done.wait (%p55_p9), [#allocation6], 32  }
  0x27   : > { %692 = vsyncadd (%p55_p9), [#allocation6], 4294967264  ;;  %s234_s6 = scalar_lea.vmem [#allocation7], %s875_s21 }
  0x28   : > { %694 = dma.done.wait (%p835_p13), %s217_s28, 16  }
  0x29   : > { %696 = vsyncadd (%p835_p13), %s217_s28, 4294967280  ;;  %v726_v0 = vmov 1   ;;  %v727_v1 = vmov 2   ;;  %v266_v2 = vld [vmem:[%s234_s6] sm:$0x1]  ;;  %v728_v4 = vmov 0.0   ;;  %v270_v10 = vlaneseq }
  0x2a   : > { %538 = vset.pattern.permute.xlu0 %v726_v0  ;;  %540 = vset.pattern.permute.xlu1 %v727_v1  ;;  %v267_v3 = vunpack.c.0.s8 %v266_v2  ;;  %v729_v6 = vmov 0   ;;  %v730_v7 = vmov 3   ;;  %v731_v11 = vmov 839922192   ;;  %v262_v13 = vld [vmem:[%s880_s23] sm:$0x3] }
  0x2b   : > { %v279_v12 = vunpack.c.l.s4 %v731_v11  ;;  %v271_v14 = vand.u32 127, %v270_v10  ;;  %s451_s7 = sshll.u32 %s715_s15, 1  ;;  %v263_v16 = vmul.f32 5.656854, %v262_v13  ;;  %v264_v17 = vld [vmem:[#allocation5] sm:$0x3] }
  0x2c   : > { %vm268_vm0 = vcmp.eq.s32.totalorder %v267_v3, 0  ;;  %s325_s22 = scalar_lea.hbm %s939_s3, %s451_s7  ;;  %s261_s15 = scalar_lea.vmem [#allocation8], %s447_s26 }
  0x2d   : > { %v269_v5 = vsel %vm268_vm0, 1.0, %v728_v4  ;;  %v280_v15 = vunpack.c.0.s8 %v279_v12  ;;  %vm272_vm1 = vcmp.ge.s32.totalorder %v271_v14, 32  ;;  %vm291_vm2 = vcmp.ge.s32.totalorder %v271_v14, 64  ;;  %s327_s24 = sshll.u32 %s261_s15, 4  ;;  %s329_s27 = sshll.u32 %s325_s22, 4  ;;  %s328_s24 = int_to_ptr.vmem [resolvable:$true] %s327_s24  ;;  %s330_s27 = int_to_ptr.hbm [resolvable:$true] %s329_s27 }
  0x2e   : > { %275 = vperm.xlu0 %538, %v269_v5   ;;  %293 = vperm.xlu1 %540, %v269_v5   ;;  %vm301_vm3 = vcmp.ge.s32.totalorder %v271_v14, 96  ;;  %v265_v24 = vadd.f32 %v264_v17, %v263_v16  ;;  %s314_s29 = scalar_lea.sflag [#allocation4], %s875_s21  ;;  %s647_s30 = sshra.s32 %s330_s27, 4  ;;  %s648_s30 = int_to_ptr.hbm [resolvable:$true] %s647_s30 }
  0x2f   : > { %s649_s4 = scalar_lea.hbm %s648_s30, 2  ;;  %s653_s20 = scalar_lea.hbm %s939_s3, 4 }
  0x30   : > { %p650_p7 = scmp.ne.s32.totalorder %s648_s30, %s649_s4  ;;  %p654_p10 = scmp.lt.s32.totalorder %s648_s30, %s939_s3 }
  0x31   : > { %p655_p11 = scmp.lt.s32.totalorder %s653_s20, %s649_s4 }
  0x32   : > { %p651_p8 = pnand %p650_p7, %p842_p0 }
  0x33   : > { %p656_p12 = por %p655_p11, %p654_p10 }
  0x34   : > { %p652_p9 = pneg %p651_p8 }
  0x36   : > { %539 = vset.pattern.permute.xlu0 %v729_v6  ;;  %541 = vset.pattern.permute.xlu1 %v730_v7  ;;  %p657_p13 = pnand %p656_p12, %p652_p9 }
  0x37   : > { %283 = vperm.xlu0 %539, %v269_v5   ;;  %303 = vperm.xlu1 %541, %v269_v5  }
  0x3f   : > { %542 = vset.pattern.permute.xlu0 %v730_v7 }
  0xa0   : > { %v276_v8 = vpop.permute.xlu0 %275  ;;  %v294_v9 = vpop.permute.xlu1 %293 }
  0xa1   : > { %v281_v20 = vperm.slane %v276_v8, %v280_v15  ;;  %v299_v23 = vperm.slane %v294_v9, %v280_v15 }
  0xa9   : > { %v284_v18 = vpop.permute.xlu0 %283  ;;  %v304_v19 = vpop.permute.xlu1 %303 }
  0xaa   : > { %v289_v21 = vperm.slane %v284_v18, %v280_v15  ;;  %v309_v22 = vperm.slane %v304_v19, %v280_v15 }
  0xac   : > { %v290_v25 = vsel %vm272_vm1, %v281_v20, %v289_v21 }
  0xad   : > { %v300_v26 = vsel %vm291_vm2, %v299_v23, %v290_v25 }
  0xae   : > { %v310_v27 = vsel %vm301_vm3, %v309_v22, %v300_v26 }
  0xaf   : > { %v311_v28 = vmul.f32 %v310_v27, %v265_v24 }
  0xb1   : > { %312 = vst [vmem:[%s261_s15] sm:$0x3] %v311_v28 }
  0xb2   : > { %660 = shalt.err (!%p657_p13)
}
  0xb3   : > { %462 = dma.vmem_to_hbm [thread:$0]  (%p842_p0), %s328_s24, 32, %s330_s27, %s314_s29  }
  0xb4 PF: > { %s341_s21 = sand.u32 1, %s703_s12   ;;  %p476_p4 = pnand %p443_p3, %p846_p2 }
  0xb5   : > { %s342_s23 = scalar_lea.sflag [#allocation4], %s341_s21 }
  0xb6   : > { %p477_p5 = pneg %p476_p4 }
  0xb8   : > { %698 = dma.done.wait (%p477_p5), %s342_s23, 32  }
  0xb9   : > { %700 = vsyncadd (%p477_p5), %s342_s23, 4294967264  ;;  %s20_s17 = sadd.s32 1, %s723_s17   ;;  %s946_s12 = smov %s707_s13 }
  0xba   : > { %p17_p1 = scmp.ge.s32.totalorder %s20_s17, 4   ;;  %s947_s13 = smov %s711_s14 }
  0xbb   : > { %s948_s14 = smov %s804_s25  ;;  %s949_s15 = smov %s719_s16 }
  0xbc   : > { %s950_s16 = smov %s952_s18  ;;  %19 = sbr.rel (!%p17_p1) target bundleno = 7 (0x7), region = 93 }
  0xc1   :  { %348 = vsyncpa [#allocation3], 1 }
  0xc2   :  { %350 = vsyncpa [#allocation3 + $0x1], 1 }
  0xc3   :  { %351 = vsyncpa [#allocation6], 1 }
  0xc4   :  { %352 = vsyncpa [#allocation4], 1 }
  0xc5   :  { %354 = vsyncpa [#allocation4 + $0x1], 1 }

</bundles_post_ra>
